<compile_context>
chip_gen: v6e
topology: v6e:2x2x1
jax: 0.10.0
libtpu: 0.0.40
codegen_flags: <defaults>
</compile_context>

<pallas_src>
import jax
import jax.numpy as jnp
from jax.experimental import pallas as pl
from jax.experimental.pallas import tpu as pltpu

_TINY_N = 1024                           # below ~1K elems pallas_call overhead dominates
_TARGET_BLOCK_BYTES = 2 * 1024 * 1024    # ~2 MiB / block buffer (~85% of HBM roofline);
                                         # in + out, double-buffered => <= 8 MiB VMEM


def _round_up(a, b):
    return ((a + b - 1) // b) * b


def _crelu_kernel(x_ref, o_ref):
    x = x_ref[...]
    # Positive branch in f32: exp(-x) - 1 then + x has <= ~2 ulp_f32 absolute
    # error, i.e. expm1-level accuracy even for bf16 inputs. The exp argument is
    # clamped to <= 0 so the untaken branch never overflows. exp sits in the EUP
    # slot and the few VALU ops are free filler under the HBM roofline.
    xf = x.astype(jnp.float32)
    pos = xf + (jnp.exp(jnp.minimum(-xf, 0.0)) - 1.0)
    o_ref[...] = jnp.where(x < 0, -x, pos.astype(x.dtype)).astype(o_ref.dtype)


def _crelu_jnp(x):
    # Module formula verbatim; XLA fuses this into a single elementwise pass
    # (1 read + 1 write of HBM), which is optimal for tiny / ragged sizes.
    return (jax.nn.relu(x) + jax.nn.elu(-x)).astype(x.dtype)


def _pick_block_rows(rows, lane, itemsize, pack):
    """Dtype-aware block sizing targeting ~2 MiB per buffer; keep grid >= 2 when
    possible so the 'parallel' grid axis feeds both v7x TensorCores."""
    target = max(pack, _TARGET_BLOCK_BYTES // (lane * itemsize))
    target = min(target, _round_up(rows, pack))
    if rows > target:
        return target                      # grid = cdiv(rows, target) >= 2
    if rows >= 2 * pack:
        half = (rows + 1) // 2             # split into two blocks -> grid == 2
        return _round_up(half, pack)
    return rows                            # tiny: single full-dim block (grid == 1)


def _crelu_2d(x2d):
    rows, lane = x2d.shape
    dtype = x2d.dtype
    itemsize = jnp.dtype(dtype).itemsize
    pack = max(8, 32 // itemsize)          # sublane packing: f32=8, bf16=16, int8/fp8=32
    block_rows = _pick_block_rows(rows, lane, itemsize, pack)
    grid = (pl.cdiv(rows, block_rows),)    # partial last block handled by Pallas
    n = rows * lane

    return pl.pallas_call(
        _crelu_kernel,
        out_shape=jax.ShapeDtypeStruct((rows, lane), dtype),
        grid_spec=pltpu.PrefetchScalarGridSpec(
            num_scalar_prefetch=0,
            grid=grid,
            in_specs=[pl.BlockSpec((block_rows, lane), lambda i: (i, 0))],
            out_specs=pl.BlockSpec((block_rows, lane), lambda i: (i, 0)),
        ),
        compiler_params=pltpu.CompilerParams(
            # Megacore sharding on v7x (2 TCs); no-op on v5e/v6e.
            dimension_semantics=("parallel",),
        ),
        cost_estimate=pl.CostEstimate(
            flops=6 * n,
            transcendentals=n,
            bytes_accessed=2 * n * itemsize,
        ),
    )(x2d)


def crelu(x):
    """relu(x) + elu(-x), elementwise, any shape. Matches CReLU.forward."""
    orig_shape = x.shape
    n = x.size
    # Tiny or ragged (n not a multiple of 128) sizes: use the fused XLA path.
    # Any repack to make the size tileable would add a full extra HBM pass,
    # which is strictly worse for this memory-bound op.
    if n < _TINY_N or n % 128 != 0:
        return _crelu_jnp(x)

    # Largest lane width in {1024, 512, 256, 128} that divides n: lane-dense
    # unmasked stores, no pad / slice copies. Flatten of a contiguous array is
    # layout plumbing, not an HBM pass.
    lane = next(c for c in (1024, 512, 256, 128) if n % c == 0)
    out2d = _crelu_2d(x.reshape(n // lane, lane))
    return out2d.reshape(orig_shape)


if __name__ == "__main__":
    key = jax.random.PRNGKey(0)
    tests = [
        ((2, 4, 16, 16), jnp.float32),    # module-sized input -> Pallas, grid=1 (full-dim block)
        ((2, 8, 32, 32), jnp.float32),    # Pallas, grid=2 (both v7x TCs get work)
        ((4, 8, 64, 64), jnp.bfloat16),   # dtype-aware blocks (sublane pack=16)
        ((2, 37, 64), jnp.float32),       # lane=128 path with a partial last row-block
        ((3, 37, 41), jnp.float32),       # ragged total size -> fused jnp fallback
        ((4, 7), jnp.float32),            # tiny -> fused jnp fallback
    ]
    ok = True
    for shape, dtype in tests:
        key, sub = jax.random.split(key)
        x = (jax.random.normal(sub, shape, dtype=jnp.float32) * 3.0).astype(dtype)
        out = crelu(x)
        jax.block_until_ready(out)
        ref = _crelu_jnp(x)  # reference: module formula (relu(x) + elu(-x))
        assert out.shape == x.shape and out.dtype == x.dtype, shape
        tol = 2e-2 if dtype == jnp.bfloat16 else 1e-5
        ok &= bool(
            jnp.allclose(out.astype(jnp.float32), ref.astype(jnp.float32),
                         atol=tol, rtol=tol)
        )
        assert ok, f"mismatch for shape={shape}, dtype={dtype}"

    print("KERNEL_OK")
</pallas_src>

<mosaic_0001>
module attributes {stable_mosaic.version = 11 : i64} {
  func.func @_crelu_kernel(%arg0: i32, %arg1: memref<2x1024xf32, #tpu.memory_space<vmem>>, %arg2: memref<2x1024xf32, #tpu.memory_space<vmem>>) attributes {dimension_semantics = [#tpu.dimension_semantics<parallel>], iteration_bounds = array<i64: 1>, scalar_prefetch = 0 : i64, scratch_operands = 0 : i64, tpu.core_type = #tpu.core_type<tc>, window_params = [{transform_indices = @transform_0, window_bounds = array<i64: 2, 1024>}, {transform_indices = @transform_1, window_bounds = array<i64: 2, 1024>}]} {
    %c0 = arith.constant 0 : index
    %c0_0 = arith.constant 0 : index
    %0 = vector.load %arg1[%c0, %c0_0] : memref<2x1024xf32, #tpu.memory_space<vmem>>, vector<2x1024xf32>
    %cst = arith.constant 0.000000e+00 : f32
    %1 = vector.broadcast %cst : f32 to vector<2x1024xf32>
    %2 = arith.subf %1, %0 : vector<2x1024xf32>
    %cst_1 = arith.constant 0.000000e+00 : f32
    %3 = vector.broadcast %cst_1 : f32 to vector<2x1024xf32>
    %4 = arith.minimumf %2, %3 : vector<2x1024xf32>
    %5 = math.exp %4 : vector<2x1024xf32>
    %cst_2 = arith.constant 1.000000e+00 : f32
    %6 = vector.broadcast %cst_2 : f32 to vector<2x1024xf32>
    %7 = arith.subf %5, %6 : vector<2x1024xf32>
    %8 = arith.addf %0, %7 : vector<2x1024xf32>
    %cst_3 = arith.constant 0.000000e+00 : f32
    %9 = vector.broadcast %cst_3 : f32 to vector<2x1024xf32>
    %10 = arith.cmpf olt, %0, %9 : vector<2x1024xf32>
    %cst_4 = arith.constant 0.000000e+00 : f32
    %11 = vector.broadcast %cst_4 : f32 to vector<2x1024xf32>
    %12 = arith.subf %11, %0 : vector<2x1024xf32>
    %13 = arith.select %10, %12, %8 : vector<2x1024xi1>, vector<2x1024xf32>
    %c0_5 = arith.constant 0 : index
    %c0_6 = arith.constant 0 : index
    %14 = vector.load %arg2[%c0_5, %c0_6] : memref<2x1024xf32, #tpu.memory_space<vmem>>, vector<2x1024xf32>
    tpu.vector_store %arg2[%c0_5, %c0_6], %13 {strides = array<i32>} : memref<2x1024xf32, #tpu.memory_space<vmem>>, vector<2x1024xf32>,
    return
  }
  func.func @transform_0(%arg0: i32) -> (i32, i32) {
    %c0_i32 = arith.constant 0 : i32
    %c0_i32_0 = arith.constant 0 : i32
    return %arg0, %c0_i32 : i32, i32
  }
  func.func @transform_1(%arg0: i32) -> (i32, i32) {
    %c0_i32 = arith.constant 0 : i32
    %c0_i32_0 = arith.constant 0 : i32
    return %arg0, %c0_i32 : i32, i32
  }
}

</mosaic_0001>

<bundles_post_ra>
// kernel: tpu_custom_call.1
= control target key start
LH: loop header
LB: loop body
LE: loop exit
PB: predicated region body
PF: predicated region fallthrough
CT: control target
= control target key end

     0   :  { %6 = vsyncpa [#allocation3], 0  ;;  %s126_s0 = inlined_call_operand.hbm [shape: f32[2,1024], index: 0, kind: input, shape index: {}]   ;;  %s127_s1 = inlined_call_operand.hbm [shape: f32[2,1024], index: 1, kind: output, shape index: {}]  }
   0x1   :  { %7 = vsyncpa [#allocation4], 0  ;;  %s108_s6 = smov [#allocation2]  }
   0x2   :  { %s14_s7 = sshll.u32 %s108_s6, 4  ;;  %s15_s7 = int_to_ptr.vmem [resolvable:$true] %s14_s7 }
   0x3   :  { %s72_s8 = scalar_lea.vmem %s15_s7, 256  ;;  %p77_p1 = scmp.lt.s32.totalorder %s15_s7, %s15_s7 }
   0x4   :  { %p73_p0 = scmp.ne.s32.totalorder %s15_s7, %s72_s8  ;;  %p78_p2 = scmp.lt.s32.totalorder %s72_s8, %s72_s8 }
   0x6   :  { %p79_p3 = por %p78_p2, %p77_p1 }
   0x8   :  { %p80_p4 = pnand %p79_p3, %p73_p0 }
   0xa   :  { %83 = shalt.err (!%p80_p4)
}
   0xb   :  { %17 = dma.hbm_to_vmem [thread:$0]  %s126_s0, 256, %s15_s7, [#allocation3]  }
   0xc   :  { %104 = dma.done.wait [#allocation3], 256  }
   0xd   :  { %105 = vsyncadd [#allocation3], 4294967040  ;;  %v21_v0 = vld [vmem:[#allocation2] sm:$0xff]  ;;  %v22_v1 = vld [vmem:[#allocation2 + $0x8] sm:$0xff]  ;;  %s109_s11 = smov [#allocation5]  }
   0xe   :  { %v23_v2 = vsub.f32 0.0, %v21_v0  ;;  %v24_v3 = vsub.f32 0.0, %v22_v1  ;;  %vm35_vm0 = vcmp.lt.f32.partialorder %v21_v0, 0.0  ;;  %s47_s12 = sshll.u32 %s109_s11, 4  ;;  %vm36_vm1 = vcmp.lt.f32.partialorder %v22_v1, 0.0  ;;  %s48_s12 = int_to_ptr.vmem [resolvable:$true] %s47_s12 }
   0xf   :  { %s84_s0 = scalar_lea.vmem %s48_s12, 256  ;;  %p89_p6 = scmp.lt.s32.totalorder %s48_s12, %s48_s12 }
  0x10   :  { %v25_v4 = vmin.f32 %v23_v2, 0.0  ;;  %v26_v5 = vmin.f32 %v24_v3, 0.0  ;;  %p85_p5 = scmp.ne.s32.totalorder %s48_s12, %s84_s0  ;;  %p90_p7 = scmp.lt.s32.totalorder %s84_s0, %s84_s0 }
  0x12   :  { %v27_v6 = vmul.f32 1.442695, %v25_v4  ;;  %v29_v7 = vmul.f32 1.442695, %v26_v5  ;;  %p91_p8 = por %p90_p7, %p89_p6 }
  0x14   :  { %60 = vpow2.f32 %v27_v6  ;;  %p92_p9 = pnand %p91_p8, %p85_p5 }
  0x15   :  { %62 = vpow2.f32 %v29_v7 }
  0x21   :  { %v61_v8 = vpop.eup %60 }
  0x22   :  { %v63_v9 = vpop.eup %62  ;;  %v56_v10 = vadd.f32 -1.0, %v61_v8 }
  0x23   :  { %v57_v11 = vadd.f32 -1.0, %v63_v9 }
  0x24   :  { %v33_v12 = vadd.f32 %v56_v10, %v21_v0 }
  0x25   :  { %v34_v13 = vadd.f32 %v57_v11, %v22_v1 }
  0x26   :  { %v37_v14 = vsel %vm35_vm0, %v23_v2, %v33_v12 }
  0x27   :  { %39 = vst [vmem:[#allocation5] sm:$0xff] %v37_v14  ;;  %v38_v15 = vsel %vm36_vm1, %v24_v3, %v34_v13 }
  0x28   :  { %40 = vst [vmem:[#allocation5 + $0x8] sm:$0xff] %v38_v15 }
  0x29   :  { %95 = shalt.err (!%p92_p9)
}
  0x2a   :  { %50 = dma.vmem_to_hbm [thread:$0]  %s48_s12, 256, %s127_s1, [#allocation4]  }
  0x2b   :  { %106 = dma.done.wait [#allocation4], 256  }
  0x2c   :  { %107 = vsyncadd [#allocation4], 4294967040 }
  0x2d   :  { %54 = vsyncpa [#allocation3], 1 }
  0x2e   :  { %55 = vsyncpa [#allocation4], 1 }

</bundles_post_ra>
